<compile_context>
chip_gen: v7x
topology: tpu7x:2x2x1
jax: 0.10.0
libtpu: 0.0.40
codegen_flags: <defaults>
</compile_context>

<pallas_src>
import jax
import jax.numpy as jnp
from jax.experimental import pallas as pl
from jax.experimental.pallas import tpu as pltpu


def _gate_kernel(x_ref, gate_ref, res_ref, o_ref):
    # Pure VPU fused multiply-add; jnp broadcasting expands the gate block
    # ((1, 1, D) or (1, TL, D)) over the tile's sequence rows.
    o_ref[...] = x_ref[...] + gate_ref[...] * res_ref[...]


def _choose_seq_tile(L, D, itemsize):
    """Rows per block: multiple of the sublane tile, ~4 MiB per stream block."""
    sub = 8 * (4 // itemsize)            # 8 rows (f32), 16 (bf16), 32 (int8/fp8)
    max_block_bytes = 4 * 1024 * 1024    # 3 streams x 2 buffers ~= 24 MiB VMEM
    tl = (max_block_bytes // max(1, D * itemsize)) // sub * sub
    tl = max(sub, tl)
    if tl >= L:
        tl = L                           # single block covers L (full-dim block)
    return tl


def _gate_call(x, gate, residual):
    """Tiled streaming FMA. Requires D % 128 == 0 unless a single (L, D) block
    is used (block == full dims is exempt from the (8,128) rule)."""
    B, L, D = x.shape
    Lg = gate.shape[1]                   # 1 (broadcast gate) or L (full gate)
    itemsize = jnp.dtype(x.dtype).itemsize

    if D % 128 == 0:
        tl = _choose_seq_tile(L, D, itemsize)
    else:
        tl = L                           # tiny irregular shapes: full-slab block

    num_l = pl.cdiv(L, tl)

    big_spec = pl.BlockSpec((1, tl, D), lambda b, l: (b, l, 0))
    if Lg == 1:
        # Block index constant across the inner (L-tile) axis -> DMA'd once
        # per batch, not once per L-tile.
        gate_spec = pl.BlockSpec((1, 1, D), lambda b, l: (b, 0, 0))
    else:
        gate_spec = pl.BlockSpec((1, tl, D), lambda b, l: (b, l, 0))

    return pl.pallas_call(
        _gate_kernel,
        out_shape=jax.ShapeDtypeStruct((B, L, D), x.dtype),
        grid_spec=pltpu.PrefetchScalarGridSpec(
            num_scalar_prefetch=0,
            grid=(B, num_l),             # L-tile axis innermost (gate reuse)
            in_specs=[big_spec, gate_spec, big_spec],
            out_specs=big_spec,
        ),
        compiler_params=pltpu.CompilerParams(
            dimension_semantics=("parallel", "parallel"),
            vmem_limit_bytes=48 * 1024 * 1024,
        ),
    )(x, gate, residual)


def gate_module(x: jax.Array, gate: jax.Array, residual: jax.Array) -> jax.Array:
    """x + gate * residual, gate broadcast over the sequence axis.

    x:        (B, L, D)
    gate:     (B, 1, D) (or anything broadcastable to it, e.g. (D,), (1,1,D));
              a full (B, L, D) gate is also accepted.
    residual: (B, L, D)
    """
    B, L, D = x.shape

    # Normalize gate: single dtype (avoid silent f32 promotion) and 3-D shape.
    gate = gate.astype(x.dtype)
    if gate.ndim < 3:
        gate = gate.reshape((1,) * (3 - gate.ndim) + gate.shape)
    Lg = gate.shape[1]
    gate = jnp.broadcast_to(gate, (B, Lg, D))
    residual = residual.astype(x.dtype)

    if D % 128 != 0 and (L * D) % 128 == 0:
        # Small / non-lane-aligned hidden size (unit tests): fold D into the
        # 128-lane axis so output blocks are lane-dense. Gate is pre-broadcast
        # here; only hit for tiny shapes, so the extra bytes are irrelevant.
        R = (L * D) // 128
        gate_full = jnp.broadcast_to(gate, (B, L, D)).reshape(B, R, 128)
        out = _gate_call(
            x.reshape(B, R, 128), gate_full, residual.reshape(B, R, 128)
        )
        return out.reshape(B, L, D)

    # Lane-aligned D (real DiT widths) -> direct tiled path; otherwise the
    # irregular-shape fallback inside _gate_call uses one full (L, D) block.
    return _gate_call(x, gate, residual)


if __name__ == "__main__":
    key = jax.random.PRNGKey(0)
    kx, kg, kr, kx2, kg2, kr2 = jax.random.split(key, 6)

    # --- Test 1: small shapes matching the module's toy usage (f32, D=32) ---
    B, L, D = 2, 8, 32
    x = jax.random.normal(kx, (B, L, D), dtype=jnp.float32)
    gate = jax.random.normal(kg, (B, 1, D), dtype=jnp.float32)
    residual = jax.random.normal(kr, (B, L, D), dtype=jnp.float32)

    out = jax.block_until_ready(gate_module(x, gate, residual))
    ref = x + gate * residual
    assert out.shape == (B, L, D)
    assert out.dtype == x.dtype
    assert jnp.allclose(out, ref, atol=1e-6, rtol=1e-6)

    # --- Test 2: lane-aligned bf16 path (exercises the tiled main path) ---
    B2, L2, D2 = 2, 32, 256
    x2 = jax.random.normal(kx2, (B2, L2, D2), dtype=jnp.bfloat16)
    gate2 = jax.random.normal(kg2, (B2, 1, D2), dtype=jnp.bfloat16)
    residual2 = jax.random.normal(kr2, (B2, L2, D2), dtype=jnp.bfloat16)

    out2 = jax.block_until_ready(gate_module(x2, gate2, residual2))
    ref2 = x2 + gate2 * residual2
    assert out2.shape == (B2, L2, D2)
    assert out2.dtype == jnp.bfloat16
    assert jnp.allclose(
        out2.astype(jnp.float32), ref2.astype(jnp.float32), atol=1e-2, rtol=1e-2
    )

    print("KERNEL_OK")
</pallas_src>

<mosaic_0001>
module attributes {stable_mosaic.version = 11 : i64} {
  func.func @_gate_kernel(%arg0: i32, %arg1: i32, %arg2: memref<1x2x128xf32, #tpu.memory_space<vmem>>, %arg3: memref<1x2x128xf32, #tpu.memory_space<vmem>>, %arg4: memref<1x2x128xf32, #tpu.memory_space<vmem>>, %arg5: memref<1x2x128xf32, #tpu.memory_space<vmem>>) attributes {dimension_semantics = [#tpu.dimension_semantics<parallel>, #tpu.dimension_semantics<parallel>], iteration_bounds = array<i64: 2, 1>, scalar_prefetch = 0 : i64, scratch_operands = 0 : i64, tpu.core_type = #tpu.core_type<tc>, window_params = [{transform_indices = @transform_0, window_bounds = array<i64: 1, 2, 128>}, {transform_indices = @transform_1, window_bounds = array<i64: 1, 2, 128>}, {transform_indices = @transform_2, window_bounds = array<i64: 1, 2, 128>}, {transform_indices = @transform_3, window_bounds = array<i64: 1, 2, 128>}]} {
    %c0 = arith.constant 0 : index
    %c0_0 = arith.constant 0 : index
    %c0_1 = arith.constant 0 : index
    %0 = vector.load %arg2[%c0, %c0_0, %c0_1] : memref<1x2x128xf32, #tpu.memory_space<vmem>>, vector<1x2x128xf32>
    %c0_2 = arith.constant 0 : index
    %c0_3 = arith.constant 0 : index
    %c0_4 = arith.constant 0 : index
    %1 = vector.load %arg3[%c0_2, %c0_3, %c0_4] : memref<1x2x128xf32, #tpu.memory_space<vmem>>, vector<1x2x128xf32>
    %c0_5 = arith.constant 0 : index
    %c0_6 = arith.constant 0 : index
    %c0_7 = arith.constant 0 : index
    %2 = vector.load %arg4[%c0_5, %c0_6, %c0_7] : memref<1x2x128xf32, #tpu.memory_space<vmem>>, vector<1x2x128xf32>
    %3 = arith.mulf %1, %2 : vector<1x2x128xf32>
    %4 = arith.addf %0, %3 : vector<1x2x128xf32>
    %c0_8 = arith.constant 0 : index
    %c0_9 = arith.constant 0 : index
    %c0_10 = arith.constant 0 : index
    %5 = vector.load %arg5[%c0_8, %c0_9, %c0_10] : memref<1x2x128xf32, #tpu.memory_space<vmem>>, vector<1x2x128xf32>
    tpu.vector_store %arg5[%c0_8, %c0_9, %c0_10], %4 {strides = array<i32>} : memref<1x2x128xf32, #tpu.memory_space<vmem>>, vector<1x2x128xf32>,
    return
  }
  func.func @transform_0(%arg0: i32, %arg1: i32) -> (i32, i32, i32) {
    %c0_i32 = arith.constant 0 : i32
    %c0_i32_0 = arith.constant 0 : i32
    return %arg0, %arg1, %c0_i32 : i32, i32, i32
  }
  func.func @transform_1(%arg0: i32, %arg1: i32) -> (i32, i32, i32) {
    %c0_i32 = arith.constant 0 : i32
    %c0_i32_0 = arith.constant 0 : i32
    return %arg0, %arg1, %c0_i32 : i32, i32, i32
  }
  func.func @transform_2(%arg0: i32, %arg1: i32) -> (i32, i32, i32) {
    %c0_i32 = arith.constant 0 : i32
    %c0_i32_0 = arith.constant 0 : i32
    return %arg0, %arg1, %c0_i32 : i32, i32, i32
  }
  func.func @transform_3(%arg0: i32, %arg1: i32) -> (i32, i32, i32) {
    %c0_i32 = arith.constant 0 : i32
    %c0_i32_0 = arith.constant 0 : i32
    return %arg0, %arg1, %c0_i32 : i32, i32, i32
  }
}

</mosaic_0001>

<bundles_post_ra>
// kernel: tpu_custom_call.1
= control target key start
LH: loop header
LB: loop body
LE: loop exit
PB: predicated region body
PF: predicated region fallthrough
CT: control target
= control target key end

     0   :  { %8 = vsyncpa [#allocation3], 0  ;;  %s891_s0 = inlined_call_operand.hbm [shape: f32[2,2,128], index: 0, kind: input, shape index: {}]   ;;  %s892_s1 = inlined_call_operand.hbm [shape: f32[2,2,128], index: 1, kind: input, shape index: {}]   ;;  %s893_s2 = inlined_call_operand.vmem [shape: f32[2,2,128], index: 2, kind: input, shape index: {}]   ;;  %s894_s3 = inlined_call_operand.hbm [shape: f32[2,2,128], index: 3, kind: output, shape index: {}]  }
   0x1   :  { %10 = vsyncpa [#allocation3 + $0x1], 0 }
   0x2   :  { %11 = vsyncpa [#allocation6], 0 }
   0x3   :  { %13 = vsyncpa [#allocation6 + $0x1], 0 }
   0x4   :  { %14 = vsyncpa [#allocation4], 0 }
   0x5   :  { %16 = vsyncpa [#allocation4 + $0x1], 0  ;;  %s666_s12 = smov 0   ;;  %s668_s13 = smov 0  }
   0x6   :  { %s670_s14 = smov 0   ;;  %s672_s15 = smov 0  }
   0x7   :  { %s674_s16 = smov 0   ;;  %s676_s17 = smov 0  }
   0x8 LB: > { %s411_s18 = sadd.s32 4294967295, %s641_s17   ;;  %s412_s19 = sadd.s32 4294967294, %s641_s17   ;;  %s641_s17 = sphi %s676_s17, %s22_s17   ;;  %s637_s16 = sphi %s674_s16, %s914_s16   ;;  %s633_s15 = sphi %s672_s15, %s913_s15   ;;  %s629_s14 = sphi %s670_s14, %s912_s14   ;;  %s625_s13 = sphi %s668_s13, %s911_s13   ;;  %s621_s12 = sphi %s666_s12, %s910_s12  }
   0x9   : > { %s34_s20 = sadd.s32 1, %s637_s16  ;;  %s43_s21 = sadd.s32 1, %s629_s14 }
   0xa   : > { %p36_p0 = scmp.ge.s32.totalorder %s34_s20, 2  ;;  %p50_p1 = scmp.ne.s32.totalorder %s629_s14, %s625_s13 }
   0xb   : > { %p51_p2 = scmp.eq.s32.totalorder %s641_s17, 0  ;;  %p56_p3 = scmp.ne.s32.totalorder %s625_s13, %s621_s12 }
   0xc   : > { %s916_s20 = smov (%p36_p0, %s34_s20), 0  ;;  %p57_p5 = scmp.eq.s32.totalorder %s411_s18, 0 }
   0xd   : > { %p707_p4 = por %p51_p2, %p50_p1  ;;  %s38_s23 = ssub.s32 %s637_s16, %s916_s20 }
   0xe   : > { %p138_p6 = scmp.eq.s32.totalorder %s411_s18, 1  ;;  %p41_p7 = scmp.eq.s32.totalorder %s38_s23, 0 }
   0xf   : > { %p713_p8 = por %p57_p5, %p56_p3  ;;  %p144_p10 = scmp.eq.s32.totalorder %s412_s19, 1 }
  0x10   : > { %p717_p9 = por %p138_p6, %p50_p1  ;;  %p445_p13 = scmp.lt.s32.totalorder %s641_s17, 2 }
  0x11   : > { %s898_s24 = scalar_select %p713_p8, 1, 0 }
  0x12   : > { %s899_s25 = scalar_select %p717_p9, 1, 0 }
  0x13   : > { %s722_s26 = scalar_select %p41_p7, %s629_s14, %s43_s21  }
  0x14   : > { %p724_p11 = por %p144_p10, %p56_p3  ;;  %s731_s28 = sand.u32 1, %s629_s14  }
  0x15   : > { %s415_s29 = sshll.u32 %s731_s28, 1  ;;  %s416_s30 = sshll.u32 %s637_s16, 5 }
  0x16   : > { %s900_s27 = scalar_select %p724_p11, 1, 0 }
  0x17   : > { %s740_s6 = scalar_lea.hbm %s891_s0, %s416_s30  ;;  %s168_s7 = scalar_lea.vmem [#allocation2], %s415_s29 }
  0x18   : > { %s176_s8 = sshll.u32 %s168_s7, 4  ;;  %p748_p0 = pnand %p445_p13, %p707_p4  ;;  %s744_s8 = int_to_ptr.vmem [resolvable:$true] %s176_s8 }
  0x19   : > { %s165_s10 = scalar_lea.sflag [#allocation3], %s731_s28  ;;  %s495_s11 = scalar_lea.hbm %s740_s6, 32 }
  0x1a   : > { %p496_p3 = scmp.ne.s32.totalorder %s740_s6, %s495_s11  ;;  %p497_p5 = pneg %p748_p0 }
  0x1b   : > { %s500_s21 = scalar_lea.hbm %s891_s0, 64  ;;  %p501_p4 = scmp.lt.u32.totalorder %s740_s6, %s891_s0 }
  0x1c   : > { %p498_p6 = pnand %p497_p5, %p496_p3  ;;  %p502_p10 = scmp.lt.u32.totalorder %s500_s21, %s495_s11 }
  0x1d   : > { %p504_p12 = scmp.lt.u32.totalorder %s495_s11, %s740_s6 }
  0x1e   : > { %p499_p7 = pneg %p498_p6  ;;  %p503_p13 = por %p502_p10, %p501_p4 }
  0x20   : > { %p505_p1 = por %p504_p12, %p503_p13 }
  0x22   : > { %p506_p2 = pnand %p505_p1, %p499_p7 }
  0x24   : > { %509 = shalt.err (!%p506_p2)
}
  0x25   : > { %s510_s4 = scalar_lea.vmem %s744_s8, 32  ;;  %s643_s5 = smov [#allocation2]  }
  0x26   : > { %p511_p3 = scmp.ne.s32.totalorder %s744_s8, %s510_s4  ;;  %s515_s7 = sshll.u32 %s643_s5, 4  ;;  %s516_s7 = int_to_ptr.vmem [resolvable:$false] %s515_s7 }
  0x27   : > { %s517_s18 = scalar_lea.vmem %s516_s7, 64  ;;  %p518_p9 = scmp.lt.s32.totalorder %s744_s8, %s516_s7 }
  0x28   : > { %p513_p6 = pnand %p511_p3, %p497_p5  ;;  %p519_p4 = scmp.lt.s32.totalorder %s517_s18, %s510_s4 }
  0x2a   : > { %p514_p11 = pneg %p513_p6  ;;  %p520_p10 = por %p519_p4, %p518_p9 }
  0x2c   : > { %p521_p12 = pnand %p520_p10, %p514_p11 }
  0x2e   : > { %524 = shalt.err (!%p521_p12)
}
  0x2f   : > { %437 = dma.hbm_to_vmem [thread:$0]  (!%p748_p0), %s740_s6, 32, %s744_s8, %s165_s10  }
  0x30   : > { %p902_p1 = scmp.lt.s32.totalorder %s641_s17, 3  ;;  %p903_p2 = scmp.ge.s32.totalorder %s641_s17, 1 }
  0x31   : > { %s793_s22 = scalar_lea.hbm %s892_s1, %s416_s30  ;;  %s187_s23 = scalar_lea.vmem [#allocation5], %s415_s29 }
  0x32   : > { %p784_p7 = pnand %p903_p2, %p902_p1  ;;  %s195_s4 = sshll.u32 %s187_s23, 4  ;;  %s196_s4 = int_to_ptr.vmem [resolvable:$true] %s195_s4 }
  0x33   : > { %s184_s6 = scalar_lea.sflag [#allocation6], %s731_s28  ;;  %s525_s8 = scalar_lea.hbm %s793_s22, 32 }
  0x34   : > { %s904_s11 = scalar_select %p784_p7, 1, 0 }
  0x35   : > { %p526_p9 = scmp.ne.s32.totalorder %s793_s22, %s525_s8  ;;  %s530_s30 = scalar_lea.hbm %s892_s1, 64 }
  0x36   : > { %p531_p3 = scmp.lt.u32.totalorder %s793_s22, %s892_s1  ;;  %p532_p6 = scmp.lt.u32.totalorder %s530_s30, %s525_s8 }
  0x37   : > { %p528_p11 = pnand %p526_p9, %p497_p5  ;;  %p534_p10 = scmp.lt.u32.totalorder %s525_s8, %s793_s22 }
  0x38   : > { %p533_p4 = por %p532_p6, %p531_p3 }
  0x39   : > { %p529_p13 = pneg %p528_p11 }
  0x3a   : > { %p535_p12 = por %p534_p10, %p533_p4 }
  0x3c   : > { %p536_p1 = pnand %p535_p12, %p529_p13 }
  0x3e   : > { %539 = shalt.err (!%p536_p1)
}
  0x3f   : > { %s540_s28 = scalar_lea.vmem %s196_s4, 32  ;;  %s644_s29 = smov [#allocation5]  }
  0x40   : > { %p541_p2 = scmp.ne.s32.totalorder %s196_s4, %s540_s28  ;;  %s545_s19 = sshll.u32 %s644_s29, 4  ;;  %s546_s19 = int_to_ptr.vmem [resolvable:$false] %s545_s19 }
  0x41   : > { %s547_s21 = scalar_lea.vmem %s546_s19, 64  ;;  %p548_p8 = scmp.lt.s32.totalorder %s196_s4, %s546_s19 }
  0x42   : > { %p543_p9 = pnand %p541_p2, %p497_p5  ;;  %p549_p7 = scmp.lt.s32.totalorder %s547_s21, %s540_s28 }
  0x44   : > { %p544_p11 = pneg %p543_p9  ;;  %p550_p3 = por %p549_p7, %p548_p8 }
  0x46   : > { %p551_p6 = pnand %p550_p3, %p544_p11 }
  0x48   : > { %554 = shalt.err (!%p551_p6)
}
  0x49   : > { %440 = dma.hbm_to_vmem [thread:$0]  (!%p748_p0), %s793_s22, 32, %s196_s4, %s184_s6  }
  0x4a   : > { %p905_p13 = scmp.ne.s32.totalorder %s904_s11, 0 }
  0x4b   : > { %s820_s23 = sand.u32 (!%p905_p13), 1, %s625_s13   ;;  %p906_p5 = scmp.ne.s32.totalorder (!%p905_p13), %s898_s24, 0 }
  0x4c   : > { %214 = sbr.rel (%p905_p13) target bundleno = 114 (0x72), region = 32  ;;  %s420_s8 = sshll.u32 (!%p905_p13), %s820_s23, 1 }
  0x4d   : > { %s217_s10 = scalar_lea.sflag (!%p905_p13), [#allocation3], %s820_s23  ;;  %s220_s5 = scalar_lea.vmem (!%p905_p13), [#allocation2], %s420_s8 }
  0x53   : > { %608 = dma.done.wait (%p906_p5), %s217_s10, 32  }
  0x54   : > { %610 = vsyncadd (%p906_p5), %s217_s10, 4294967264  ;;  %s226_s9 = scalar_lea.sflag [#allocation6], %s820_s23  ;;  %s229_s22 = scalar_lea.vmem [#allocation5], %s420_s8 }
  0x55   : > { %612 = dma.done.wait (%p906_p5), %s226_s9, 32  }
  0x56   : > { %614 = vsyncadd (%p906_p5), %s226_s9, 4294967264  ;;  %p264_p8 = scmp.lt.s32.totalorder %s633_s15, 1  ;;  %s263_s18 = scalar_lea.vmem [#allocation7], %s420_s8  ;;  %v271_v0 = vld [vmem:[%s220_s5] sm:$0x3] }
  0x57   : > { %s292_s28 = sshll.u32 %s263_s18, 4  ;;  %s425_s29 = sshll.u32 %s633_s15, 5  ;;  %v272_v1 = vld [vmem:[%s229_s22] sm:$0x3]  ;;  %s839_s28 = int_to_ptr.vmem [resolvable:$true] %s292_s28 }
  0x58   : > { %s265_s11 = scalar_select %p264_p8, %s633_s15, 1 }
  0x59   : > { %s844_s21 = scalar_lea.hbm %s894_s3, %s425_s29  ;;  %s278_s10 = scalar_lea.sflag [#allocation4], %s820_s23 }
  0x5a   : > { %s423_s4 = sshll.u32 %s265_s11, 1  ;;  %s555_s8 = scalar_lea.vmem %s839_s28, 32 }
  0x5b   : > { %s270_s7 = scalar_lea.vmem %s893_s2, %s423_s4  ;;  %p556_p0 = scmp.ne.s32.totalorder %s839_s28, %s555_s8 }
  0x5c   : > { %v273_v2 = vld [vmem:[%s270_s7] sm:$0x3]  ;;  %p907_p7 = scmp.ne.s32.totalorder %s899_s25, 0  ;;  %s645_s15 = smov [#allocation7]  }
  0x5d   : > { %v274_v3 = vmul.f32 %v273_v2, %v272_v1  ;;  %s559_s5 = sshll.u32 %s645_s15, 4  ;;  %s560_s5 = int_to_ptr.vmem [resolvable:$false] %s559_s5 }
  0x5e   : > { %p557_p4 = pnand %p556_p0, %p907_p7  ;;  %s561_s9 = scalar_lea.vmem %s560_s5, 64 }
  0x5f   : > { %v275_v4 = vadd.f32 %v274_v3, %v271_v0  ;;  %p562_p12 = scmp.lt.s32.totalorder %s839_s28, %s560_s5  ;;  %p563_p1 = scmp.lt.s32.totalorder %s561_s9, %s555_s8 }
  0x60   : > { %p558_p10 = pneg %p557_p4 }
  0x61   : > { %276 = vst [vmem:[%s263_s18] sm:$0x3] %v275_v4  ;;  %p564_p2 = por %p563_p1, %p562_p12 }
  0x63   : > { %p565_p9 = pnand %p564_p2, %p558_p10 }
  0x65   : > { %568 = shalt.err (!%p565_p9)
}
  0x66   : > { %s569_s23 = scalar_lea.hbm %s844_s21, 32  ;;  %s573_s4 = scalar_lea.hbm %s894_s3, 64 }
  0x67   : > { %p570_p11 = scmp.ne.s32.totalorder %s844_s21, %s569_s23  ;;  %p574_p13 = scmp.lt.u32.totalorder %s844_s21, %s894_s3 }
  0x68   : > { %p575_p5 = scmp.lt.u32.totalorder %s573_s4, %s569_s23  ;;  %p577_p0 = scmp.lt.u32.totalorder %s569_s23, %s844_s21 }
  0x69   : > { %p571_p3 = pnand %p570_p11, %p907_p7 }
  0x6a   : > { %p576_p8 = por %p575_p5, %p574_p13 }
  0x6b   : > { %p572_p6 = pneg %p571_p3 }
  0x6c   : > { %p578_p4 = por %p577_p0, %p576_p8 }
  0x6e   : > { %p579_p10 = pnand %p578_p4, %p572_p6 }
  0x70   : > { %582 = shalt.err (!%p579_p10)
}
  0x71   : > { %432 = dma.vmem_to_hbm [thread:$0]  (%p907_p7), %s839_s28, 32, %s844_s21, %s278_s10  }
  0x72 PF: > { %s304_s7 = sand.u32 1, %s621_s12   ;;  %p908_p12 = scmp.ne.s32.totalorder %s900_s27, 0 }
  0x73   : > { %p909_p1 = scmp.ge.s32.totalorder %s641_s17, 2  ;;  %s305_s18 = scalar_lea.sflag [#allocation4], %s304_s7 }
  0x75   : > { %p442_p2 = pnand %p909_p1, %p908_p12 }
  0x77   : > { %616 = dma.done.wait (!%p442_p2), %s305_s18, 32  }
  0x78   : > { %618 = vsyncadd (!%p442_p2), %s305_s18, 4294967264  ;;  %s22_s17 = sadd.s32 1, %s641_s17   ;;  %s910_s12 = smov %s625_s13 }
  0x79   : > { %p19_p9 = scmp.ge.s32.totalorder %s22_s17, 4   ;;  %s911_s13 = smov %s629_s14 }
  0x7a   : > { %s912_s14 = smov %s722_s26  ;;  %s913_s15 = smov %s637_s16 }
  0x7b   : > { %s914_s16 = smov %s916_s20  ;;  %21 = sbr.rel (!%p19_p9) target bundleno = 8 (0x8), region = 93 }
  0x82   :  { %310 = vsyncpa [#allocation3], 1 }
  0x83   :  { %312 = vsyncpa [#allocation3 + $0x1], 1 }
  0x84   :  { %313 = vsyncpa [#allocation6], 1 }
  0x85   :  { %315 = vsyncpa [#allocation6 + $0x1], 1 }
  0x86   :  { %316 = vsyncpa [#allocation4], 1 }
  0x87   :  { %318 = vsyncpa [#allocation4 + $0x1], 1 }

</bundles_post_ra>
